<compile_context>
chip_gen: v6e
topology: v6e:2x2x1
jax: 0.10.0
libtpu: 0.0.40
codegen_flags: <defaults>
</compile_context>

<pallas_src>
import jax
import jax.numpy as jnp
from jax.experimental import pallas as pl
from jax.experimental.pallas import tpu as pltpu


def decoder_kernel(z_ref, w1_ref, b1_ref, w2_ref, b2_ref, out_ref):
    # z_ref:  (TB, z_dim)        bf16
    # w1_ref: (z_dim, hidden)    bf16
    # b1_ref: (1, hidden)        f32
    # w2_ref: (hidden, 784)      bf16
    # b2_ref: (1, 784)           f32
    # out_ref:(TB, 784)          f32
    z = z_ref[...]

    # fc1 (bf16 MXU inputs, f32 accumulate) + stable softplus
    h = jnp.dot(z, w1_ref[...], preferred_element_type=jnp.float32) + b1_ref[...]
    h = jnp.maximum(h, 0.0) + jnp.log1p(jnp.exp(-jnp.abs(h)))

    # fc21 (bf16 MXU inputs, f32 accumulate) + sigmoid via EUP reciprocal
    logits = (
        jnp.dot(h.astype(jnp.bfloat16), w2_ref[...],
                preferred_element_type=jnp.float32)
        + b2_ref[...]
    )
    sig = pl.reciprocal(1.0 + jnp.exp(-logits), approx=True)
    out_ref[...] = sig.astype(out_ref.dtype)


def decoder_forward(z, w1_t, b1, w2_t, b2, *, tb_max=1024):
    """z: (B, z_dim); w1_t: (z_dim, hidden); w2_t: (hidden, 784). Returns f32 (B, 784)."""
    B, z_dim = z.shape
    hidden = w1_t.shape[1]
    out_dim = w2_t.shape[1]

    # MXU wants bf16 inputs; keep f32 accumulation inside the kernel.
    z_bf = z.astype(jnp.bfloat16)
    w1_bf = w1_t.astype(jnp.bfloat16)
    w2_bf = w2_t.astype(jnp.bfloat16)
    b1_f = b1.reshape(1, hidden).astype(jnp.float32)
    b2_f = b2.reshape(1, out_dim).astype(jnp.float32)

    # Batch tile: multiple of 8 (sublanes), capped at tb_max.
    # TB=1024 keeps per-step VMEM (out tile 3.1 MiB x2 bufs + inputs + weights)
    # well under the 16 MiB v5e default scoped limit.
    tb = min(tb_max, max(8, ((B + 7) // 8) * 8))
    b_pad = ((B + tb - 1) // tb) * tb
    if b_pad != B:
        z_bf = jnp.pad(z_bf, ((0, b_pad - B), (0, 0)))

    grid = (b_pad // tb,)
    out = pl.pallas_call(
        decoder_kernel,
        out_shape=jax.ShapeDtypeStruct((b_pad, out_dim), jnp.float32),
        grid=grid,
        in_specs=[
            pl.BlockSpec((tb, z_dim), lambda i: (i, 0)),        # streamed per tile
            pl.BlockSpec((z_dim, hidden), lambda i: (0, 0)),    # resident weights
            pl.BlockSpec((1, hidden), lambda i: (0, 0)),        # resident bias
            pl.BlockSpec((hidden, out_dim), lambda i: (0, 0)),  # resident weights
            pl.BlockSpec((1, out_dim), lambda i: (0, 0)),       # resident bias
        ],
        out_specs=pl.BlockSpec((tb, out_dim), lambda i: (i, 0)),
        compiler_params=pltpu.CompilerParams(
            dimension_semantics=("parallel",),   # megacore split on v7x
            vmem_limit_bytes=32 * 1024 * 1024,   # headroom, safe on v5e/v6e/v7x
        ),
    )(z_bf, w1_bf, b1_f, w2_bf, b2_f)
    return out[:B]


def init_decoder_params(key, z_dim, hidden_dim, out_dim=784):
    """Deterministic PyTorch-default-style init (uniform +/- 1/sqrt(fan_in)).

    Weights are stored pre-transposed to (in_features, out_features)."""
    k1, k2, k3, k4 = jax.random.split(key, 4)
    bound1 = 1.0 / jnp.sqrt(z_dim)
    bound2 = 1.0 / jnp.sqrt(hidden_dim)
    w1_t = jax.random.uniform(k1, (z_dim, hidden_dim), jnp.float32, -bound1, bound1)
    b1 = jax.random.uniform(k2, (1, hidden_dim), jnp.float32, -bound1, bound1)
    w2_t = jax.random.uniform(k3, (hidden_dim, out_dim), jnp.float32, -bound2, bound2)
    b2 = jax.random.uniform(k4, (1, out_dim), jnp.float32, -bound2, bound2)
    return w1_t, b1, w2_t, b2


def decoder_reference(z, w1_t, b1, w2_t, b2):
    h = jax.nn.softplus(z @ w1_t + b1)
    return jax.nn.sigmoid(h @ w2_t + b2)


if __name__ == "__main__":
    Z_DIM, HIDDEN_DIM = 8, 32

    key = jax.random.PRNGKey(0)
    kz, kp, kz2 = jax.random.split(key, 3)
    w1_t, b1, w2_t, b2 = init_decoder_params(kp, Z_DIM, HIDDEN_DIM)

    # Case 1: small batch, single grid step.
    B = 8
    z = jax.random.normal(kz, (B, Z_DIM), jnp.float32)
    loc_img = jax.block_until_ready(decoder_forward(z, w1_t, b1, w2_t, b2))
    ref = decoder_reference(z, w1_t, b1, w2_t, b2)
    assert loc_img.shape == (B, 784)
    # bf16 MXU inputs + approx reciprocal -> loosened tolerance vs f32 reference
    assert jnp.max(jnp.abs(loc_img - ref)) < 3e-2

    # Case 2: ragged batch exercising padding + multi-step grid.
    B2 = 20
    z2 = jax.random.normal(kz2, (B2, Z_DIM), jnp.float32)
    loc_img2 = jax.block_until_ready(
        decoder_forward(z2, w1_t, b1, w2_t, b2, tb_max=16))
    ref2 = decoder_reference(z2, w1_t, b1, w2_t, b2)
    assert loc_img2.shape == (B2, 784)
    assert jnp.max(jnp.abs(loc_img2 - ref2)) < 3e-2

    print("KERNEL_OK")
</pallas_src>

<mosaic_0001>
module attributes {stable_mosaic.version = 11 : i64} {
  func.func @decoder_kernel(%arg0: i32, %arg1: memref<8x8xbf16, #tpu.memory_space<vmem>>, %arg2: memref<8x32xbf16, #tpu.memory_space<vmem>>, %arg3: memref<1x32xf32, #tpu.memory_space<vmem>>, %arg4: memref<32x784xbf16, #tpu.memory_space<vmem>>, %arg5: memref<1x784xf32, #tpu.memory_space<vmem>>, %arg6: memref<8x784xf32, #tpu.memory_space<vmem>>) attributes {dimension_semantics = [#tpu.dimension_semantics<parallel>], iteration_bounds = array<i64: 1>, scalar_prefetch = 0 : i64, scratch_operands = 0 : i64, tpu.core_type = #tpu.core_type<tc>, window_params = [{transform_indices = @transform_0, window_bounds = array<i64: 8, 8>}, {pipeline_mode = #tpu.pipeline_mode<synchronous>, transform_indices = @transform_1, window_bounds = array<i64: 8, 32>}, {pipeline_mode = #tpu.pipeline_mode<synchronous>, transform_indices = @transform_2, window_bounds = array<i64: 1, 32>}, {pipeline_mode = #tpu.pipeline_mode<synchronous>, transform_indices = @transform_3, window_bounds = array<i64: 32, 784>}, {pipeline_mode = #tpu.pipeline_mode<synchronous>, transform_indices = @transform_4, window_bounds = array<i64: 1, 784>}, {transform_indices = @transform_5, window_bounds = array<i64: 8, 784>}]} {
    %c0 = arith.constant 0 : index
    %c0_0 = arith.constant 0 : index
    %0 = vector.load %arg1[%c0, %c0_0] : memref<8x8xbf16, #tpu.memory_space<vmem>>, vector<8x8xbf16>
    %c0_1 = arith.constant 0 : index
    %c0_2 = arith.constant 0 : index
    %1 = vector.load %arg2[%c0_1, %c0_2] : memref<8x32xbf16, #tpu.memory_space<vmem>>, vector<8x32xbf16>
    %cst = arith.constant dense<0.000000e+00> : vector<8x32xf32>
    %2 = tpu.matmul %0, %1, %cst {dimension_numbers = #tpu.dot_dimension_numbers<[1], [0], [0], [1], [0, 0, 1, 1], [], []>} : vector<8x8xbf16>, vector<8x32xbf16>, vector<8x32xf32> -> vector<8x32xf32>
    %c0_3 = arith.constant 0 : index
    %c0_4 = arith.constant 0 : index
    %3 = vector.load %arg3[%c0_3, %c0_4] : memref<1x32xf32, #tpu.memory_space<vmem>>, vector<1x32xf32>
    %4 = vector.broadcast %3 : vector<1x32xf32> to vector<8x32xf32>
    %5 = arith.addf %2, %4 : vector<8x32xf32>
    %cst_5 = arith.constant 0.000000e+00 : f32
    %6 = vector.broadcast %cst_5 : f32 to vector<8x32xf32>
    %7 = arith.maximumf %5, %6 : vector<8x32xf32>
    %8 = math.absf %5 : vector<8x32xf32>
    %cst_6 = arith.constant 0.000000e+00 : f32
    %9 = vector.broadcast %cst_6 : f32 to vector<8x32xf32>
    %10 = arith.subf %9, %8 : vector<8x32xf32>
    %11 = math.exp %10 : vector<8x32xf32>
    %12 = math.log1p %11 : vector<8x32xf32>
    %13 = arith.addf %7, %12 : vector<8x32xf32>
    %14 = arith.truncf %13 : vector<8x32xf32> to vector<8x32xbf16>
    %c0_7 = arith.constant 0 : index
    %c0_8 = arith.constant 0 : index
    %15 = vector.load %arg4[%c0_7, %c0_8] : memref<32x784xbf16, #tpu.memory_space<vmem>>, vector<32x784xbf16>
    %cst_9 = arith.constant dense<0.000000e+00> : vector<8x784xf32>
    %16 = tpu.matmul %14, %15, %cst_9 {dimension_numbers = #tpu.dot_dimension_numbers<[1], [0], [0], [1], [0, 0, 1, 1], [], []>} : vector<8x32xbf16>, vector<32x784xbf16>, vector<8x784xf32> -> vector<8x784xf32>
    %c0_10 = arith.constant 0 : index
    %c0_11 = arith.constant 0 : index
    %17 = vector.load %arg5[%c0_10, %c0_11] : memref<1x784xf32, #tpu.memory_space<vmem>>, vector<1x784xf32>
    %18 = vector.broadcast %17 : vector<1x784xf32> to vector<8x784xf32>
    %19 = arith.addf %16, %18 : vector<8x784xf32>
    %cst_12 = arith.constant 0.000000e+00 : f32
    %20 = vector.broadcast %cst_12 : f32 to vector<8x784xf32>
    %21 = arith.subf %20, %19 : vector<8x784xf32>
    %22 = math.exp %21 : vector<8x784xf32>
    %cst_13 = arith.constant 1.000000e+00 : f32
    %23 = vector.broadcast %cst_13 : f32 to vector<8x784xf32>
    %24 = arith.addf %23, %22 : vector<8x784xf32>
    %25 = tpu.reciprocal %24 {approx = true} : vector<8x784xf32> -> vector<8x784xf32>
    %c0_14 = arith.constant 0 : index
    %c0_15 = arith.constant 0 : index
    %26 = vector.load %arg6[%c0_14, %c0_15] : memref<8x784xf32, #tpu.memory_space<vmem>>, vector<8x784xf32>
    tpu.vector_store %arg6[%c0_14, %c0_15], %25 {strides = array<i32>} : memref<8x784xf32, #tpu.memory_space<vmem>>, vector<8x784xf32>,
    return
  }
  func.func @transform_0(%arg0: i32) -> (i32, i32) {
    %c0_i32 = arith.constant 0 : i32
    %c0_i32_0 = arith.constant 0 : i32
    return %arg0, %c0_i32 : i32, i32
  }
  func.func @transform_1(%arg0: i32) -> (i32, i32) {
    %c0_i32 = arith.constant 0 : i32
    %c0_i32_0 = arith.constant 0 : i32
    %c0_i32_1 = arith.constant 0 : i32
    return %c0_i32, %c0_i32_0 : i32, i32
  }
  func.func @transform_2(%arg0: i32) -> (i32, i32) {
    %c0_i32 = arith.constant 0 : i32
    %c0_i32_0 = arith.constant 0 : i32
    %c0_i32_1 = arith.constant 0 : i32
    return %c0_i32, %c0_i32_0 : i32, i32
  }
  func.func @transform_3(%arg0: i32) -> (i32, i32) {
    %c0_i32 = arith.constant 0 : i32
    %c0_i32_0 = arith.constant 0 : i32
    %c0_i32_1 = arith.constant 0 : i32
    return %c0_i32, %c0_i32_0 : i32, i32
  }
  func.func @transform_4(%arg0: i32) -> (i32, i32) {
    %c0_i32 = arith.constant 0 : i32
    %c0_i32_0 = arith.constant 0 : i32
    %c0_i32_1 = arith.constant 0 : i32
    return %c0_i32, %c0_i32_0 : i32, i32
  }
  func.func @transform_5(%arg0: i32) -> (i32, i32) {
    %c0_i32 = arith.constant 0 : i32
    %c0_i32_0 = arith.constant 0 : i32
    return %arg0, %c0_i32 : i32, i32
  }
}

</mosaic_0001>

<bundles_post_ra>
// kernel: tpu_custom_call.1
= control target key start
LH: loop header
LB: loop body
LE: loop exit
PB: predicated region body
PF: predicated region fallthrough
CT: control target
= control target key end

     0   :  { %10 = vsyncpa [#allocation3], 0  ;;  %s774_s0 = inlined_call_operand.hbm [shape: bf16[8,8], index: 0, kind: input, shape index: {}]   ;;  %s775_s1 = inlined_call_operand.hbm [shape: bf16[8,32], index: 1, kind: input, shape index: {}]   ;;  %s776_s2 = inlined_call_operand.hbm [shape: f32[1,32], index: 2, kind: input, shape index: {}]   ;;  %s777_s3 = inlined_call_operand.hbm [shape: bf16[32,784], index: 3, kind: input, shape index: {}]   ;;  %s778_s4 = inlined_call_operand.vmem [shape: f32[1,784], index: 4, kind: input, shape index: {}]   ;;  %s779_s5 = inlined_call_operand.hbm [shape: f32[8,784], index: 5, kind: output, shape index: {}]  }
   0x1   :  { %11 = vsyncpa [#allocation6], 0 }
   0x2   :  { %12 = vsyncpa [#allocation9], 0 }
   0x3   :  { %13 = vsyncpa [#allocation4], 0  ;;  %s705_s18 = smov [#allocation5]   ;;  %s706_s20 = smov [#allocation2]  }
   0x4   :  { %s30_s19 = sshll.u32 %s705_s18, 4  ;;  %s20_s21 = sshll.u32 %s706_s20, 4  ;;  %s31_s19 = int_to_ptr.vmem [resolvable:$true] %s30_s19  ;;  %s21_s21 = int_to_ptr.vmem [resolvable:$true] %s20_s21 }
   0x5   :  { %s605_s22 = scalar_lea.vmem %s31_s19, 64  ;;  %p610_p1 = scmp.lt.s32.totalorder %s31_s19, %s31_s19 }
   0x6   :  { %p606_p0 = scmp.ne.s32.totalorder %s31_s19, %s605_s22  ;;  %p611_p2 = scmp.lt.s32.totalorder %s605_s22, %s605_s22 }
   0x8   :  { %p612_p3 = por %p611_p2, %p610_p1 }
   0xa   :  { %p613_p4 = pnand %p612_p3, %p606_p0 }
   0xc   :  { %616 = shalt.err (!%p613_p4)
}
   0xd   :  { %33 = dma.hbm_to_vmem [thread:$0]  %s775_s1, 64, %s31_s19, [#allocation6]  }
   0xe   :  { %s625_s25 = scalar_lea.vmem %s21_s21, 64  ;;  %p630_p6 = scmp.lt.s32.totalorder %s21_s21, %s21_s21 }
   0xf   :  { %p626_p5 = scmp.ne.s32.totalorder %s21_s21, %s625_s25  ;;  %p631_p7 = scmp.lt.s32.totalorder %s625_s25, %s625_s25 }
  0x11   :  { %p632_p8 = por %p631_p7, %p630_p6 }
  0x13   :  { %p633_p9 = pnand %p632_p8, %p626_p5 }
  0x15   :  { %636 = shalt.err (!%p633_p9)
}
  0x16   :  { %23 = dma.hbm_to_vmem [thread:$0]  %s774_s0, 64, %s21_s21, [#allocation3]  }
  0x17   :  { %s707_s28 = smov [#allocation7]   ;;  %s708_s30 = smov [#allocation8]  }
  0x18   :  { %s40_s29 = sshll.u32 %s707_s28, 4  ;;  %s49_s6 = sshll.u32 %s708_s30, 4  ;;  %s41_s29 = int_to_ptr.vmem [resolvable:$true] %s40_s29  ;;  %s50_s6 = int_to_ptr.vmem [resolvable:$true] %s49_s6 }
  0x19   :  { %s645_s7 = scalar_lea.vmem %s41_s29, 16  ;;  %s649_s1 = scalar_lea.vmem %s41_s29, 32 }
  0x1a   :  { %p646_p10 = scmp.ne.s32.totalorder %s41_s29, %s645_s7  ;;  %p650_p11 = scmp.lt.s32.totalorder %s41_s29, %s41_s29 }
  0x1b   :  { %p651_p12 = scmp.lt.s32.totalorder %s649_s1, %s645_s7 }
  0x1d   :  { %p652_p13 = por %p651_p12, %p650_p11 }
  0x1f   :  { %p653_p0 = pnand %p652_p13, %p646_p10 }
  0x21   :  { %656 = shalt.err (!%p653_p0)
}
  0x22   :  { %43 = dma.hbm_to_vmem [thread:$0]  %s776_s2, 16, %s41_s29, [#allocation6]  }
  0x23   :  { %s665_s10 = scalar_lea.vmem %s50_s6, 1792  ;;  %p670_p2 = scmp.lt.s32.totalorder %s50_s6, %s50_s6 }
  0x24   :  { %p666_p1 = scmp.ne.s32.totalorder %s50_s6, %s665_s10  ;;  %p671_p3 = scmp.lt.s32.totalorder %s665_s10, %s665_s10 }
  0x26   :  { %p672_p4 = por %p671_p3, %p670_p2 }
  0x28   :  { %p673_p5 = pnand %p672_p4, %p666_p1 }
  0x2a   :  { %676 = shalt.err (!%p673_p5)
}
  0x2b   :  { %s709_s0 = smov 448   ;;  %s710_s11 = smov 28  }
  0x2c   :  { %55 = dma.hbm_to_vmem [thread:$0]  %s777_s3, 1792, %s50_s6, [#allocation9], %s709_s0, %s709_s0, %s710_s11  }
  0x2d   :  { %697 = dma.done.wait [#allocation3], 64  }
  0x2e   :  { %698 = vsyncadd [#allocation3], 4294967232 }
  0x2f   :  { %699 = dma.done.wait [#allocation6], 80  }
  0x30   :  { %700 = vsyncadd [#allocation6], 4294967216 }
  0x31   :  { %701 = dma.done.wait [#allocation9], 1792  }
  0x32   :  { %702 = vsyncadd [#allocation9], 4294965504  ;;  %v711_v0 = vmov 0.0   ;;  %vm712_vm0 = vmmov 0   ;;  %vm84_vm1 = vcmask 1043456   ;;  %vm80_vm2 = vcmask 64512  }
  0x33   :  { %521 = vmatprep.subr.bf16.mxu0 %v711_v0  ;;  %523 = vmatprep.mubr.msk.bf16.mxu0 %vm712_vm0, %v711_v0  ;;  %v72_v1 = vld [vmem:[#allocation5] sm:$0xf]  ;;  %v71_v2 = vld [vmem:[#allocation2] sm:$0xf]  ;;  %v550_v5 = vld [vmem:[#allocation8 + $0x44] ss:$28 sps:$4 sm:$0xff]   ;;  %v162_v40 = vlaneseq }
  0x34   :  { %v86_v3 = vsel %vm84_vm1, %v72_v1, 0  ;;  %v545_v4 = vld [vmem:[#allocation8 + $0x3c] ss:$28 sps:$4 sm:$0xff]   ;;  %v551_v8 = vld [vmem:[#allocation8 + $0x4] ss:$28 sps:$4 sm:$0xff]   ;;  %v713_v13 = vmov 0  }
  0x35   :  { %522 = vmatpush3.bf16.msra.mxu0 %v86_v3  ;;  %v547_v6 = vld [vmem:[#allocation8 + $0x38] ss:$28 sps:$4 sm:$0xff]   ;;  %v548_v7 = vld [vmem:[#allocation8 + $0x40] ss:$28 sps:$4 sm:$0xff]   ;;  %285 = vmatprep.subr.bf16.mxu1 %v545_v4  ;;  %v556_v9 = vld [vmem:[#allocation8 + $0xc] ss:$28 sps:$4 sm:$0xff]  }
  0x36   :  { %326 = vmatprep.subr.bf16.mxu0 %v550_v5  ;;  %286 = vmatpush1.bf16.msra.mxu1 %v547_v6  ;;  %v553_v10 = vld [vmem:[#allocation8] ss:$28 sps:$4 sm:$0xff]   ;;  %v554_v11 = vld [vmem:[#allocation8 + $0x8] ss:$28 sps:$4 sm:$0xff]   ;;  %vm269_vm4 = vcmask 261120   ;;  %v163_v41 = vshrl.u32 %v162_v40, 7 }
  0x37   :  { %287 = vmatprep.subr.bf16.mxu1 %v551_v8  ;;  %v559_v12 = vld [vmem:[#allocation8 + $0x4c] ss:$28 sps:$4 sm:$0xff]   ;;  %305 = vmatprep.mubr.bf16.mxu1 %v713_v13  ;;  %v496_v14 = vld [vmem:[#allocation7] ss:$0 sm:$0xff]  ;;  %v563_v37 = vld [vmem:[#allocation8 + $0x14] ss:$28 sps:$4 sm:$0xff]  }
  0x38   :  { %524 = vmatmul.mubr.msk.bf16.vlgmr.msra.gmra.mxu0 %vm80_vm2, %v71_v2  ;;  %v557_v34 = vld [vmem:[#allocation8 + $0x48] ss:$28 sps:$4 sm:$0xff]   ;;  %v560_v35 = vld [vmem:[#allocation8 + $0x50] ss:$28 sps:$4 sm:$0xff]   ;;  %v564_v39 = vld [vmem:[#allocation8 + $0x18] ss:$28 sps:$4 sm:$0xff]  }
  0x39   :  { %327 = vmatpush1.bf16.msra.mxu0 %v548_v7  ;;  %346 = vmatprep.mubr.bf16.mxu0 %v713_v13  ;;  %v561_v38 = vld [vmem:[#allocation8 + $0x10] ss:$28 sps:$4 sm:$0xff]   ;;  %v164_v42 = vsub.s32 0, %v163_v41  ;;  %v172_v43 = vsub.s32 2, %v163_v41  ;;  %v168_v45 = vsub.s32 1, %v163_v41  ;;  %v176_v46 = vsub.s32 3, %v163_v41 }
  0x3a   :  { %328 = vmatprep.subr.bf16.mxu0 %v556_v9  ;;  %288 = vmatpush1.bf16.msra.mxu1 %v553_v10  ;;  %v160_v44 = vld [vmem:[%s778_s4] sm:$0x7f]  ;;  %v180_v53 = vsub.s32 4, %v163_v41  ;;  %v188_v54 = vsub.s32 6, %v163_v41  ;;  %v184_v59 = vsub.s32 5, %v163_v41  ;;  %s714_s4 = smov [#allocation10]  }
  0x3b   :  { %367 = vmatprep.subr.bf16.mxu1 %v559_v12  ;;  %v165_v47 = vrot.slane %v160_v44, %v164_v42  ;;  %v173_v48 = vrot.slane %v160_v44, %v172_v43  ;;  %v169_v49 = vrot.slane %v160_v44, %v168_v45  ;;  %v177_v50 = vrot.slane %v160_v44, %v176_v46  ;;  %s485_s14 = sshll.u32 %s714_s4, 4  ;;  %s486_s14 = int_to_ptr.vmem [resolvable:$true] %s485_s14 }
  0x3c   :  { %v181_v2 = vrot.slane %v160_v44, %v180_v53  ;;  %v189_v3 = vrot.slane %v160_v44, %v188_v54  ;;  %v185_v12 = vrot.slane %v160_v44, %v184_v59  ;;  %vm477_vm5 = vcmask 130048   ;;  %s677_s15 = scalar_lea.vmem %s486_s14, 896  ;;  %p682_p7 = scmp.lt.s32.totalorder %s486_s14, %s486_s14 }
  0x3d   :  { %329 = vmatpush1.bf16.msra.mxu0 %v554_v11  ;;  %p678_p6 = scmp.ne.s32.totalorder %s486_s14, %s677_s15  ;;  %p683_p8 = scmp.lt.s32.totalorder %s677_s15, %s677_s15 }
  0x3e   :  { %527 = vmatprep.subr.bf16.mxu0 %v711_v0 }
  0x3f   :  { %p684_p9 = por %p683_p8, %p682_p7 }
  0x41   :  { %p685_p10 = pnand %p684_p9, %p678_p6 }
  0xf8   :  { %v122_v15 = vpop.f32.mrf.mxu0 }
  0xf9   :  { %v123_v16 = vadd.f32 %v496_v14, %v122_v15 }
  0xfa   :  { %v525_v17 = vpop.f32.mrf.mxu0 }
  0xfb   :  { %v129_v18 = vand.u32 2147483647, %v123_v16  ;;  %v128_v31 = vmax.f32 %v123_v16, 0.0 }
  0xfc   :  { %v125_v19 = vpop.f32.mrf.mxu0 }
  0xfd   :  { %v130_v20 = vsub.f32 0.0, %v129_v18 }
  0xfe   :  { %v526_v21 = vpop.f32.mrf.mxu0 }
  0xff   :  { %v131_v22 = vmul.f32 1.442695, %v130_v20 }
 0x101   :  { %565 = vpow2.f32 %v131_v22 }
 0x10e   :  { %v566_v23 = vpop.eup %565 }
 0x10f   :  { %v133_v24 = vadd.f32 1.0, %v566_v23  ;;  %v136_v25 = vmul.f32 -0.5, %v566_v23  ;;  %v139_v27 = vand.u32 2147483647, %v566_v23 }
 0x111   :  { %567 = vlog2.f32 %v133_v24  ;;  %v137_v26 = vadd.f32 1.0, %v136_v25  ;;  %vm140_vm3 = vcmp.lt.f32.partialorder %v139_v27, 0.0004427343 }
 0x113   :  { %v138_v30 = vmul.f32 %v566_v23, %v137_v26 }
 0x11e   :  { %v568_v28 = vpop.eup %567 }
 0x11f   :  { %v135_v29 = vmul.f32 0.6931472, %v568_v28 }
 0x121   :  { %v141_v32 = vsel %vm140_vm3, %v138_v30, %v135_v29 }
 0x122   :  { %v142_v33 = vadd.f32 %v141_v32, %v128_v31 }
 0x124   :  { %v143_v36 = vpack.c.bf16 %v142_v33, %v142_v33 }
 0x126   :  { %512 = vmatmul.mubr.msk.bf16.vlgmr.msra.gmra.mxu1 %vm269_vm4, %v143_v36  ;;  %513 = vmatmul.mubr.msk.bf16.vlgmr.msra.gmra.mxu0 %vm269_vm4, %v143_v36 }
 0x127   :  { %368 = vmatpush1.bf16.msra.mxu1 %v557_v34  ;;  %528 = vmatpush3.bf16.msra.mxu0 %v560_v35 }
 0x128   :  { %369 = vmatprep.subr.bf16.mxu1 %v563_v37  ;;  %529 = vmatprep.subr.bf16.mxu0 %v711_v0 }
 0x129   :  { %387 = vmatprep.mubr.bf16.mxu1 %v713_v13  ;;  %531 = vmatprep.mubr.msk.bf16.mxu0 %vm712_vm0, %v711_v0 }
 0x12b   :  { %370 = vmatpush1.bf16.msra.mxu1 %v561_v38  ;;  %530 = vmatpush3.bf16.msra.mxu0 %v564_v39 }
 0x12e   :  { %514 = vmatmul.mubr.msk.bf16.vlgmr.msra.gmra.mxu1 %vm269_vm4, %v143_v36  ;;  %532 = vmatmul.mubr.msk.bf16.vlgmr.msra.gmra.mxu0 %vm269_vm4, %v143_v36 }
 0x1e6   :  { %v307_v51 = vpop.f32.mrf.mxu1  ;;  %v348_v52 = vpop.f32.mrf.mxu0 }
 0x1e7   :  { %v308_v55 = vadd.f32 %v307_v51, %v165_v47  ;;  %v349_v56 = vadd.f32 %v348_v52, %v173_v48 }
 0x1e8   :  { %v309_v57 = vpop.f32.mrf.mxu1  ;;  %v350_v58 = vpop.f32.mrf.mxu0 }
 0x1e9   :  { %v436_v60 = vsub.f32 0.0, %v308_v55  ;;  %v438_v61 = vsub.f32 0.0, %v349_v56  ;;  %v310_v62 = vadd.f32 %v309_v57, %v169_v49  ;;  %v351_v63 = vadd.f32 %v350_v58, %v177_v50 }
 0x1ea   :  { %v311_v0 = vpop.f32.mrf.mxu1  ;;  %v352_v1 = vpop.f32.mrf.mxu0 }
 0x1eb   :  { %v443_v4 = vmul.f32 1.442695, %v436_v60  ;;  %v447_v5 = vmul.f32 1.442695, %v438_v61  ;;  %v437_v6 = vsub.f32 0.0, %v310_v62  ;;  %v439_v7 = vsub.f32 0.0, %v351_v63 }
 0x1ec   :  { %v312_v8 = vpop.f32.mrf.mxu1  ;;  %v353_v9 = vpop.f32.mrf.mxu0 }
 0x1ed   :  { %569 = vpow2.f32 %v443_v4  ;;  %v445_v10 = vmul.f32 1.442695, %v437_v6  ;;  %v449_v11 = vmul.f32 1.442695, %v439_v7 }
 0x1ee   :  { %571 = vpow2.f32 %v447_v5  ;;  %v389_v13 = vpop.f32.mrf.mxu1  ;;  %v430_v14 = vpop.f32.mrf.mxu0 }
 0x1ef   :  { %573 = vpow2.f32 %v445_v10  ;;  %v390_v15 = vadd.f32 %v389_v13, %v181_v2  ;;  %v431_v16 = vadd.f32 %v430_v14, %v189_v3 }
 0x1f0   :  { %575 = vpow2.f32 %v449_v11  ;;  %v391_v17 = vpop.f32.mrf.mxu1  ;;  %v533_v18 = vpop.f32.mrf.mxu0 }
 0x1f1   :  { %v440_v19 = vsub.f32 0.0, %v390_v15  ;;  %v442_v20 = vsub.f32 0.0, %v431_v16  ;;  %v392_v21 = vadd.f32 %v391_v17, %v185_v12 }
 0x1f2   :  { %v393_v22 = vpop.f32.mrf.mxu1  ;;  %v433_v23 = vpop.f32.mrf.mxu0 }
 0x1f3   :  { %v451_v24 = vmul.f32 1.442695, %v440_v19  ;;  %v455_v25 = vmul.f32 1.442695, %v442_v20  ;;  %v441_v26 = vsub.f32 0.0, %v392_v21 }
 0x1f4   :  { %v394_v27 = vpop.f32.mrf.mxu1  ;;  %v534_v28 = vpop.f32.mrf.mxu0 }
 0x1f5   :  { %577 = vpow2.f32 %v451_v24  ;;  %v453_v29 = vmul.f32 1.442695, %v441_v26 }
 0x1f6   :  { %579 = vpow2.f32 %v455_v25 }
 0x1f7   :  { %581 = vpow2.f32 %v453_v29 }
 0x1fa   :  { %v570_v30 = vpop.eup %569 }
 0x1fb   :  { %v572_v31 = vpop.eup %571  ;;  %v457_v32 = vadd.f32 1.0, %v570_v30 }
 0x1fc   :  { %v574_v33 = vpop.eup %573  ;;  %v459_v34 = vadd.f32 1.0, %v572_v31 }
 0x1fd   :  { %v576_v35 = vpop.eup %575  ;;  %583 = vrcp.f32 %v457_v32  ;;  %v458_v36 = vadd.f32 1.0, %v574_v33 }
 0x1fe   :  { %585 = vrcp.f32 %v459_v34  ;;  %v460_v37 = vadd.f32 1.0, %v576_v35 }
 0x1ff   :  { %587 = vrcp.f32 %v458_v36 }
 0x200   :  { %589 = vrcp.f32 %v460_v37 }
 0x202   :  { %v578_v38 = vpop.eup %577 }
 0x203   :  { %v580_v39 = vpop.eup %579  ;;  %v461_v40 = vadd.f32 1.0, %v578_v38 }
 0x204   :  { %v582_v41 = vpop.eup %581  ;;  %v463_v42 = vadd.f32 1.0, %v580_v39 }
 0x205   :  { %591 = vrcp.f32 %v461_v40  ;;  %v462_v43 = vadd.f32 1.0, %v582_v41 }
 0x206   :  { %593 = vrcp.f32 %v463_v42 }
 0x207   :  { %595 = vrcp.f32 %v462_v43 }
 0x20a   :  { %v584_v44 = vpop.eup %583 }
 0x20b   :  { %v586_v45 = vpop.eup %585  ;;  %471 = vst [vmem:[#allocation10] sm:$0xff] %v584_v44 }
 0x20c   :  { %v588_v46 = vpop.eup %587  ;;  %473 = vst [vmem:[#allocation10 + $0x10] sm:$0xff] %v586_v45 }
 0x20d   :  { %v590_v47 = vpop.eup %589  ;;  %472 = vst [vmem:[#allocation10 + $0x8] sm:$0xff] %v588_v46 }
 0x20e   :  { %474 = vst [vmem:[#allocation10 + $0x18] sm:$0xff] %v590_v47 }
 0x212   :  { %v592_v48 = vpop.eup %591 }
 0x213   :  { %v594_v49 = vpop.eup %593  ;;  %475 = vst [vmem:[#allocation10 + $0x20] sm:$0xff] %v592_v48 }
 0x214   :  { %v596_v50 = vpop.eup %595  ;;  %478 = vst.msk [vmem:[#allocation10 + $0x30] sm:$0xff] %vm477_vm5, %v594_v49 }
 0x215   :  { %476 = vst [vmem:[#allocation10 + $0x28] sm:$0xff] %v596_v50 }
 0x216   :  { %688 = shalt.err (!%p685_p10)
}
 0x217   :  { %488 = dma.vmem_to_hbm [thread:$0]  %s486_s14, 896, %s779_s5, [#allocation4]  }
 0x218   :  { %703 = dma.done.wait [#allocation4], 896  }
 0x219   :  { %704 = vsyncadd [#allocation4], 4294966400 }
 0x21a   :  { %492 = vsyncpa [#allocation3], 1 }
 0x21b   :  { %493 = vsyncpa [#allocation6], 1 }
 0x21c   :  { %494 = vsyncpa [#allocation9], 1 }
 0x21d   :  { %495 = vsyncpa [#allocation4], 1 }

</bundles_post_ra>
